<compile_context>
chip_gen: v5e
topology: v5e:2x2
jax: 0.10.0
libtpu: 0.0.40
codegen_flags: <defaults>
</compile_context>

<pallas_src>
import jax
import jax.numpy as jnp
import numpy as np
from jax.experimental import pallas as pl
from jax.experimental.pallas import tpu as pltpu


def _plane_kernel(a_ref, b_ref, badd_ref, out_ref):
    # One MXU matmul + one elementwise add; single lane-dense full-block store.
    out_ref[...] = jnp.dot(a_ref[...], b_ref[...],
                           preferred_element_type=jnp.float32,
                           precision=jax.lax.Precision.HIGHEST) + badd_ref[...]


def _tensorcores_per_chip():
    # v7x has 2 TensorCores per chip; v5e/v6e have 1. Fallback to 1 on any doubt.
    try:
        kind = jax.devices()[0].device_kind.lower()
        if "v7" in kind or "7x" in kind:
            return 2
    except Exception:
        pass
    return 1


def bern_ibf_linear_layer(inputs_under, inputs_over, layer_weights, layer_biases,
                          intervals, row_tile=None):
    """LayerModule(activation='linear') forward. Returns stacked per-node outputs."""
    K, V1 = inputs_under.shape
    V = V1 - 1
    L = layer_weights.shape[0]
    assert layer_weights.shape == (L, K)

    W = layer_weights.astype(jnp.float32)
    w_pos = jnp.maximum(W, 0.0)
    w_neg = -jnp.maximum(-W, 0.0)
    iu = inputs_under.astype(jnp.float32)
    io = inputs_over.astype(jnp.float32)
    iv = intervals.astype(jnp.float32)
    b = layer_biases.astype(jnp.float32).reshape(L)

    # Fused operands (rows 0..L-1 -> under, L..2L-1 -> over):
    #   under = w_neg @ io + w_pos @ iu ;  over = w_pos @ io + w_neg @ iu
    a_mat = jnp.concatenate([jnp.concatenate([w_neg, w_pos], axis=1),
                             jnp.concatenate([w_pos, w_neg], axis=1)], axis=0)  # (2L, 2K)
    b_mat = jnp.concatenate([io, iu], axis=0)                                   # (2K, V1)

    # zero-short-circuit flags of ibf_tensor_prod_input_weights (grid-invariant, hoisted)
    iu_zero = jnp.all(iu == 0.0)
    io_zero = jnp.all(io == 0.0)
    wp_zero = jnp.all(w_pos == 0.0, axis=1)                 # (L,)
    wn_zero = jnp.all(w_neg == 0.0, axis=1)
    u_both = (wn_zero | io_zero) & (wp_zero | iu_zero)      # both under terms degenerate
    o_both = (wp_zero | io_zero) & (wn_zero | iu_zero)      # both over  terms degenerate

    # bias-add matrix reproducing torch's `row[-1] += bias` quirk:
    #   2-D (1, V1) row  -> bias added to EVERY coefficient,
    #   1-D all-zero row -> bias added to the constant (last) coefficient only.
    last = (jnp.arange(V1) == V1 - 1)[None, :]

    def _bias_rows(both):
        return jnp.where(both[:, None], jnp.where(last, b[:, None], 0.0), b[:, None])

    badd = jnp.concatenate([_bias_rows(u_both), _bias_rows(o_both)], axis=0)    # (2L, V1)

    # degrees: each per-node degree row is all-0 (both prods short-circuited) or all-1
    ones_v = jnp.ones((1, V), jnp.float32)
    deg_u = jnp.where(u_both, 0.0, 1.0)[:, None] * ones_v
    deg_o = jnp.where(o_both, 0.0, 1.0)[:, None] * ones_v

    # ---- node-dependent r==0 coefficient plane, lane layout f = c*V1 + i ----
    #   plane[n, c*V1 + i] = coeffs[n, i] * (intervals[0, c] if i == 0 else 1)
    # Interval scale folded into the matmul RHS and the bias rows (single dot in-kernel).
    scale = jnp.ones((2, V1), jnp.float32).at[:, 0].set(iv[0, :])                # (2, V1)
    b_plane = (b_mat[:, None, :] * scale[None, :, :]).reshape(2 * K, 2 * V1)
    badd_plane = (badd[:, None, :] * scale[None, :, :]).reshape(2 * L, 2 * V1)

    lanes = 2 * V1
    Fp = ((lanes + 127) // 128) * 128            # pad lane axis -> unmasked lane-dense vst
    b_plane = jnp.pad(b_plane, ((0, 0), (0, Fp - lanes)))
    badd_plane = jnp.pad(badd_plane, ((0, 0), (0, Fp - lanes)))

    # ---- generation-aware row tiling + explicit VMEM budget ----
    rows = 2 * L
    if row_tile is None:
        row_tile = rows
        n_cores = _tensorcores_per_chip()
        if n_cores > 1 and rows >= 16:
            row_tile = max(8, ((-(-rows // n_cores)) + 7) // 8 * 8)   # >=2 tiles on v7x
    vmem_budget = 24 << 20                                    # per-core safe even on v7x
    fixed = 8 * (2 * K) * Fp                                  # b_plane (f32, 2 buffers)
    per_row = 8 * (2 * K + 2 * Fp)                            # a + badd + out blocks
    cap = max(8, int(max(vmem_budget - fixed, 0) // per_row) // 8 * 8)
    row_tile = min(row_tile, cap)

    if row_tile >= rows:
        row_tile = rows
        rows_p = rows
    else:
        row_tile = max(8, (row_tile // 8) * 8)
        rows_p = ((rows + row_tile - 1) // row_tile) * row_tile
        a_mat = jnp.pad(a_mat, ((0, rows_p - rows), (0, 0)))
        badd_plane = jnp.pad(badd_plane, ((0, rows_p - rows), (0, 0)))
    n_tiles = rows_p // row_tile

    est_vmem = fixed + per_row * row_tile
    vmem_limit = int(min(48 << 20, max(2 * est_vmem, 16 << 20)))

    plane = pl.pallas_call(
        _plane_kernel,
        grid=(n_tiles,),
        in_specs=[
            pl.BlockSpec((row_tile, 2 * K), lambda t: (t, 0)),   # fused weights
            pl.BlockSpec((2 * K, Fp), lambda t: (0, 0)),         # interval-scaled inputs
            pl.BlockSpec((row_tile, Fp), lambda t: (t, 0)),      # bias-quirk rows (scaled)
        ],
        out_specs=pl.BlockSpec((row_tile, Fp), lambda t: (t, 0)),
        out_shape=jax.ShapeDtypeStruct((rows_p, Fp), jnp.float32),
        compiler_params=pltpu.CompilerParams(
            dimension_semantics=("parallel",),
            vmem_limit_bytes=vmem_limit),
    )(a_mat, b_plane, badd_plane)

    # kernel plane -> [n, i, c]
    plane = plane[:rows, :lanes].reshape(rows, 2, V1).transpose(0, 2, 1)

    # ---- node-independent r!=0 constant pattern: wrapper broadcast (no kernel bytes) ----
    const = jnp.ones((V1, V, 2), jnp.float32)
    dvar = jnp.arange(V)
    const = const.at[dvar, dvar, :].set(iv)          # row r==i (i < n_vars) = intervals[i]
    full = jnp.broadcast_to(const[None], (rows, V1, V, 2))
    full = full.at[:, :, 0, :].set(plane)            # r==0 plane from the kernel
    full = full.reshape(rows, V1 * V, 2)

    return full[:L], full[L:], deg_u, deg_o


def network_forward(inputs, intervals, network_weights, network_biases, network_size,
                    delta_error=1e-3):
    """NetworkModule.forward.  Only the 'linear' (output-layer) path is supported."""
    inputs_under = inputs
    inputs_over = inputs
    num_layers = len(network_size) - 1
    under_deg = over_deg = None
    for i in range(num_layers):
        is_last = (i == num_layers - 1)
        if not is_last:
            # TODO(synk): 'relu' hidden-layer path requires ibf_minmax_cpp, relu_monom_coeffs,
            # quad_of_poly and {upper,lower}_linear_ibf_1_lin, which are external & undefined
            # in the reference module; only the 'linear' output-layer path is implemented.
            raise NotImplementedError("relu hidden layers are not implemented")
        inputs_under, inputs_over, under_deg, over_deg = bern_ibf_linear_layer(
            inputs_under, inputs_over, network_weights[i], network_biases[i], intervals)
    return inputs_under, inputs_over, under_deg, over_deg


# ----------------------------- numpy reference ------------------------------
def _numpy_reference(inputs, intervals, W, bias):
    n_vars = inputs.shape[1] - 1
    wpos = np.maximum(W, 0.0)
    wneg = -np.maximum(-W, 0.0)
    iu = inputs
    io = inputs

    def prod(inp, w):
        if np.all(np.abs(w) == 0.0) or np.all(np.abs(inp) == 0.0):
            return np.zeros(n_vars + 1, np.float32), np.zeros(n_vars, np.float32)
        return (w.reshape(1, -1) @ inp), np.ones(n_vars, np.float32)

    def gen_lin_ibf(coeffs):
        coeffs = coeffs.reshape(-1)
        blocks = []
        for i in range(n_vars + 1):
            blk = np.ones((n_vars, 2), np.float32)
            if i != n_vars:
                blk[i, :] = intervals[i]
            blk[0, :] *= coeffs[i]
            blocks.append(blk)
        return np.concatenate(blocks, axis=0)

    unders, overs, udegs, odegs = [], [], [], []
    for j in range(W.shape[0]):
        u1, d1 = prod(io, wneg[j]); u2, d2 = prod(iu, wpos[j])
        under = u1 + u2
        udeg = np.maximum(d1, d2)
        under = np.array(under, copy=True)
        under[-1] = under[-1] + bias[j]            # torch quirk: 2-D row -> all coeffs
        o1, e1 = prod(io, wpos[j]); o2, e2 = prod(iu, wneg[j])
        over = o1 + o2
        odeg = np.maximum(e1, e2)
        over = np.array(over, copy=True)
        over[-1] = over[-1] + bias[j]
        unders.append(gen_lin_ibf(under))
        overs.append(gen_lin_ibf(over))
        udegs.append(udeg)
        odegs.append(odeg)
    return (np.stack(unders), np.stack(overs),
            np.stack(udegs).astype(np.float32), np.stack(odegs).astype(np.float32))


if __name__ == "__main__":
    n_vars = 4
    layer_size = 8
    network_size = [n_vars, layer_size]   # single layer -> 'linear' activation

    key = jax.random.PRNGKey(0)
    k1, k2, k3, k4 = jax.random.split(key, 4)
    inputs = jax.random.normal(k1, (n_vars, n_vars + 1), dtype=jnp.float32)
    W = jax.random.normal(k2, (layer_size, n_vars), dtype=jnp.float32)
    W = W.at[layer_size - 1].set(0.0)            # all-zero-weight short-circuit case
    W = W.at[0].set(jnp.abs(W[0]) + 0.1)         # all-positive row: one-sided short-circuit
    b = jax.random.normal(k3, (layer_size,), dtype=jnp.float32)
    lo = -jnp.abs(jax.random.normal(k4, (n_vars,), dtype=jnp.float32))
    intervals = jnp.stack([lo, lo + 2.0], axis=1)    # (n_vars, 2) [low, high]

    outs = network_forward(inputs, intervals, [W], [b], network_size)
    outs = jax.block_until_ready(outs)

    ref = _numpy_reference(np.asarray(inputs), np.asarray(intervals),
                           np.asarray(W), np.asarray(b))
    for got, want in zip(outs, ref):
        np.testing.assert_allclose(np.asarray(got), want, rtol=1e-5, atol=1e-5)
    print("KERNEL_OK")
</pallas_src>

<mosaic_0001>
module attributes {stable_mosaic.version = 11 : i64} {
  func.func @_plane_kernel(%arg0: i32, %arg1: memref<16x8xf32, #tpu.memory_space<vmem>>, %arg2: memref<8x128xf32, #tpu.memory_space<vmem>>, %arg3: memref<16x128xf32, #tpu.memory_space<vmem>>, %arg4: memref<16x128xf32, #tpu.memory_space<vmem>>) attributes {dimension_semantics = [#tpu.dimension_semantics<parallel>], iteration_bounds = array<i64: 1>, scalar_prefetch = 0 : i64, scratch_operands = 0 : i64, tpu.core_type = #tpu.core_type<tc>, window_params = [{transform_indices = @transform_0, window_bounds = array<i64: 16, 8>}, {pipeline_mode = #tpu.pipeline_mode<synchronous>, transform_indices = @transform_1, window_bounds = array<i64: 8, 128>}, {transform_indices = @transform_2, window_bounds = array<i64: 16, 128>}, {transform_indices = @transform_3, window_bounds = array<i64: 16, 128>}]} {
    %c0 = arith.constant 0 : index
    %c0_0 = arith.constant 0 : index
    %0 = vector.load %arg1[%c0, %c0_0] : memref<16x8xf32, #tpu.memory_space<vmem>>, vector<16x8xf32>
    %c0_1 = arith.constant 0 : index
    %c0_2 = arith.constant 0 : index
    %1 = vector.load %arg2[%c0_1, %c0_2] : memref<8x128xf32, #tpu.memory_space<vmem>>, vector<8x128xf32>
    %cst = arith.constant dense<0.000000e+00> : vector<16x128xf32>
    %2 = tpu.matmul %0, %1, %cst {dimension_numbers = #tpu.dot_dimension_numbers<[1], [0], [0], [1], [0, 0, 1, 1], [], []>, precision = #tpu.contract_precision<fp32>} : vector<16x8xf32>, vector<8x128xf32>, vector<16x128xf32> -> vector<16x128xf32>
    %c0_3 = arith.constant 0 : index
    %c0_4 = arith.constant 0 : index
    %3 = vector.load %arg3[%c0_3, %c0_4] : memref<16x128xf32, #tpu.memory_space<vmem>>, vector<16x128xf32>
    %4 = arith.addf %2, %3 : vector<16x128xf32>
    %c0_5 = arith.constant 0 : index
    %c0_6 = arith.constant 0 : index
    %5 = vector.load %arg4[%c0_5, %c0_6] : memref<16x128xf32, #tpu.memory_space<vmem>>, vector<16x128xf32>
    tpu.vector_store %arg4[%c0_5, %c0_6], %4 {strides = array<i32>} : memref<16x128xf32, #tpu.memory_space<vmem>>, vector<16x128xf32>,
    return
  }
  func.func @transform_0(%arg0: i32) -> (i32, i32) {
    %c0_i32 = arith.constant 0 : i32
    %c0_i32_0 = arith.constant 0 : i32
    return %arg0, %c0_i32 : i32, i32
  }
  func.func @transform_1(%arg0: i32) -> (i32, i32) {
    %c0_i32 = arith.constant 0 : i32
    %c0_i32_0 = arith.constant 0 : i32
    %c0_i32_1 = arith.constant 0 : i32
    return %c0_i32, %c0_i32_0 : i32, i32
  }
  func.func @transform_2(%arg0: i32) -> (i32, i32) {
    %c0_i32 = arith.constant 0 : i32
    %c0_i32_0 = arith.constant 0 : i32
    return %arg0, %c0_i32 : i32, i32
  }
  func.func @transform_3(%arg0: i32) -> (i32, i32) {
    %c0_i32 = arith.constant 0 : i32
    %c0_i32_0 = arith.constant 0 : i32
    return %arg0, %c0_i32 : i32, i32
  }
}

</mosaic_0001>

<bundles_post_ra>
// kernel: tpu_custom_call.1
= control target key start
LH: loop header
LB: loop body
LE: loop exit
PB: predicated region body
PF: predicated region fallthrough
CT: control target
= control target key end

     0   :  { %vm20_vm0 = vcmask 64512   ;;  %s296_s0 = inlined_call_operand.vmem [shape: f32[16,8], index: 0, kind: input, shape index: {}]   ;;  %s297_s1 = inlined_call_operand.vmem [shape: f32[8,128], index: 1, kind: input, shape index: {}]   ;;  %s298_s2 = inlined_call_operand.vmem [shape: f32[16,128], index: 2, kind: input, shape index: {}]   ;;  %s299_s3 = inlined_call_operand.hbm [shape: f32[16,128], index: 3, kind: output, shape index: {}]  }
   0x1   :  { %v17_v0 = vld [vmem:[%s297_s1] sm:$0xff]  ;;  %v16_v1 = vld [vmem:[%s296_s0 + $0x8] sm:$0xff] }
   0x2   :  { %v15_v2 = vld [vmem:[%s296_s0] sm:$0xff]  ;;  %v42_v3 = vand.u32 4294901760, %v17_v0  ;;  %v25_v4 = vsel %vm20_vm0, %v16_v1, 0 }
   0x3   :  { %v22_v5 = vsel %vm20_vm0, %v15_v2, 0 }
   0x4   :  { %8 = vsyncpa [#allocation3], 0  ;;  %v52_v6 = vand.u32 4294901760, %v25_v4  ;;  %v44_v7 = vand.u32 4294901760, %v22_v5  ;;  %224 = vmatpush.msra.mxu2 %v42_v3  ;;  %v77_v8 = vsub.f32 %v17_v0, %v42_v3  ;;  %43 = vmatpush.msra.mxu0 %v42_v3  ;;  %v18_v21 = vld [vmem:[%s298_s2] sm:$0xff]  ;;  %v19_v28 = vld [vmem:[%s298_s2 + $0x8] sm:$0xff] }
   0x5   :  { %s255_s20 = smov [#allocation2]   ;;  %s212_s2 = sshll.u32 %s299_s3, 4  ;;  %s213_s2 = int_to_ptr.hbm [resolvable:$true] %s212_s2 }
   0x6   :  { %v53_v9 = vsub.f32 %v25_v4, %v52_v6  ;;  %v45_v10 = vsub.f32 %v22_v5, %v44_v7  ;;  %108 = vmatpush.msrb.mxu2 %v77_v8  ;;  %v78_v11 = vand.u32 4294901760, %v77_v8  ;;  %s210_s21 = sshll.u32 %s255_s20, 4  ;;  %s256_s24 = smov 128   ;;  %s211_s21 = int_to_ptr.vmem [resolvable:$true] %s210_s21 }
   0x7   :  { %s257_s25 = smov 8  }
   0x8   :  { %v54_v12 = vand.u32 4294901760, %v53_v9  ;;  %v46_v13 = vand.u32 4294901760, %v45_v10  ;;  %v79_v14 = vsub.f32 %v77_v8, %v78_v11  ;;  %168 = vmatpush.msrb.mxu0 %v78_v11 }
   0xa   :  { %v55_v15 = vsub.f32 %v53_v9, %v54_v12  ;;  %v47_v16 = vsub.f32 %v45_v10, %v46_v13  ;;  %v80_v17 = vand.u32 4294901760, %v79_v14 }
   0xc   :  { %v56_v18 = vand.u32 4294901760, %v55_v15  ;;  %v48_v19 = vand.u32 4294901760, %v47_v16  ;;  %225 = vmatpush.msra.mxu3 %v80_v17  ;;  %81 = vmatpush.msra.mxu1 %v80_v17 }
   0xd   :  { %87 = vmatmul.f32.vlgmr.msra.gmra.mxu3 %v52_v6  ;;  %83 = vmatmul.f32.vlgmr.msra.gmra.mxu1 %v44_v7 }
   0xe   :  { %57 = vmatmul.f32.vlgmr.msra.gmra.mxu2 %v56_v18  ;;  %136 = vmatpush.msrb.mxu3 %v42_v3 }
   0xf   :  { %49 = vmatmul.f32.vlgmr.msra.gmra.mxu0 %v48_v19  ;;  %194 = vmatpush.msrb.mxu1 %v42_v3 }
  0x15   :  { %140 = vmatmul.f32.vlgmr.msrb.gmra.mxu3 %v46_v13  ;;  %196 = vmatmul.f32.vlgmr.msrb.gmra.mxu1 %v44_v7 }
  0x16   :  { %111 = vmatmul.f32.vlgmr.msrb.gmra.mxu2 %v45_v10 }
  0x17   :  { %170 = vmatmul.f32.vlgmr.msrb.gmra.mxu0 %v44_v7 }
  0x1d   :  { %146 = vmatmul.f32.gmra.mxu3 %v54_v12  ;;  %200 = vmatmul.f32.gmra.mxu1 %v52_v6 }
  0x1e   :  { %116 = vmatmul.f32.gmra.mxu2 %v53_v9 }
  0x1f   :  { %174 = vmatmul.f32.gmra.mxu0 %v52_v6 }
  0x8a   :  { %v84_v22 = vpop.f32.mrf.mxu1 }
  0x8c   :  { %v50_v20 = vpop.f32.mrf.mxu0 }
  0x8d   :  { %v51_v25 = vadd.f32 %v50_v20, %v18_v21 }
  0x8f   :  { %v85_v26 = vadd.f32 %v84_v22, %v51_v25 }
  0x90   :  { %v88_v24 = vpop.f32.mrf.mxu3 }
  0x91   :  { %v58_v23 = vpop.f32.mrf.mxu2 }
  0x92   :  { %v197_v32 = vpop.f32.mrf.mxu1  ;;  %v59_v33 = vadd.f32 %v58_v23, %v19_v28 }
  0x94   :  { %v171_v27 = vpop.f32.mrf.mxu0  ;;  %v89_v36 = vadd.f32 %v88_v24, %v59_v33 }
  0x98   :  { %v141_v30 = vpop.f32.mrf.mxu3 }
  0x99   :  { %v112_v29 = vpop.f32.mrf.mxu2 }
  0x9a   :  { %v113_v31 = vadd.f32 %v112_v29, %v85_v26  ;;  %v201_v43 = vpop.f32.mrf.mxu1 }
  0x9c   :  { %v142_v34 = vadd.f32 %v141_v30, %v113_v31  ;;  %v175_v41 = vpop.f32.mrf.mxu0 }
  0x9e   :  { %v172_v35 = vadd.f32 %v171_v27, %v142_v34 }
  0xa0   :  { %v198_v37 = vadd.f32 %v197_v32, %v172_v35  ;;  %v147_v39 = vpop.f32.mrf.mxu3 }
  0xa1   :  { %v117_v38 = vpop.f32.mrf.mxu2 }
  0xa2   :  { %204 = vst [vmem:[#allocation2] sm:$0xff] %v198_v37  ;;  %v118_v40 = vadd.f32 %v117_v38, %v89_v36 }
  0xa4   :  { %v148_v42 = vadd.f32 %v147_v39, %v118_v40 }
  0xa6   :  { %v176_v44 = vadd.f32 %v175_v41, %v148_v42 }
  0xa8   :  { %v202_v45 = vadd.f32 %v201_v43, %v176_v44 }
  0xaa   :  { %205 = vst [vmem:[#allocation2 + $0x8] sm:$0xff] %v202_v45 }
  0xab   :  { %218 = dma.vmem_to_hbm [thread:$0]  %s211_s21, 256, %s213_s2, [#allocation3], %s256_s24, %s256_s24, %s257_s25  }
  0xac   :  { %253 = dma.done.wait [#allocation3], 256  }
  0xad   :  { %254 = vsyncadd [#allocation3], 4294967040 }
  0xae   :  { %223 = vsyncpa [#allocation3], 1 }

</bundles_post_ra>
